<compile_context>
chip_gen: v6e
topology: v6e:2x2x1
jax: 0.10.0
libtpu: 0.0.40
codegen_flags: <defaults>
</compile_context>

<pallas_src>
import jax
import jax.numpy as jnp
from jax import lax
from jax.experimental import pallas as pl
from jax.experimental.pallas import tpu as pltpu


def _round_up(n, m):
    return ((n + m - 1) // m) * m


# ----------------------------- kernels --------------------------------------


def _svm_single_block_kernel(x_ref, w_ref, b_ref, o_ref):
    # x: [B, F]   w: [C_pad, F]   b: [1, C_pad]   o: [B, C_pad]
    acc = lax.dot_general(
        x_ref[...], w_ref[...],
        dimension_numbers=(((1,), (1,)), ((), ())),   # contract over F (A @ B.T)
        preferred_element_type=jnp.float32,
    )
    o_ref[...] = (acc + b_ref[...]).astype(o_ref.dtype)


def _svm_tiled_kernel(x_ref, w_ref, b_ref, o_ref, acc_ref):
    # grid = (B_pad//tm, F_pad//tk); axis 1 (F) is the reduction axis.
    k = pl.program_id(1)

    @pl.when(k == 0)
    def _():
        acc_ref[...] = jnp.zeros_like(acc_ref)

    acc_ref[...] += lax.dot_general(
        x_ref[...], w_ref[...],
        dimension_numbers=(((1,), (1,)), ((), ())),   # contract over F (A @ B.T)
        preferred_element_type=jnp.float32,
    )

    @pl.when(k == pl.num_programs(1) - 1)
    def _():
        # bias added once, in the finalize branch only
        o_ref[...] = (acc_ref[...] + b_ref[...]).astype(o_ref.dtype)


# ----------------------------- wrapper ---------------------------------------


def svm_forward(x, weight, bias, *, tm=256, tk=2048):
    """SVM forward. x: [B, F], weight: [C, F] (PyTorch layout), bias: [C]."""
    B, F = x.shape
    C = weight.shape[0]

    # Lane-dense output: pad the class dim up to a multiple of 128.
    C_pad = max(128, _round_up(C, 128))
    if C_pad != C:
        weight = jnp.pad(weight, ((0, C_pad - C), (0, 0)))
        bias = jnp.pad(bias, ((0, C_pad - C),))
    b2 = bias.reshape(1, C_pad)

    # ---- small path: whole problem fits in one tile -> grid-less call ------
    if _round_up(B, 8) <= tm and _round_up(F, 128) <= tk:
        out = pl.pallas_call(
            _svm_single_block_kernel,
            out_shape=jax.ShapeDtypeStruct((B, C_pad), x.dtype),
            in_specs=[
                pl.BlockSpec(memory_space=pltpu.MemorySpace.VMEM),
                pl.BlockSpec(memory_space=pltpu.MemorySpace.VMEM),
                pl.BlockSpec(memory_space=pltpu.MemorySpace.VMEM),
            ],
            out_specs=pl.BlockSpec(memory_space=pltpu.MemorySpace.VMEM),
        )(x, weight, b2)
        return out[:, :C]

    # ---- tiled path: (B tiles, F tiles) grid, F reduction last -------------
    B_pad = _round_up(B, tm)
    F_pad = _round_up(F, tk)
    if B_pad != B or F_pad != F:
        x = jnp.pad(x, ((0, B_pad - B), (0, F_pad - F)))
    if F_pad != F:
        weight = jnp.pad(weight, ((0, 0), (0, F_pad - F)))

    grid = (B_pad // tm, F_pad // tk)

    out = pl.pallas_call(
        _svm_tiled_kernel,
        out_shape=jax.ShapeDtypeStruct((B_pad, C_pad), x.dtype),
        grid_spec=pltpu.PrefetchScalarGridSpec(
            num_scalar_prefetch=0,
            grid=grid,
            in_specs=[
                pl.BlockSpec((tm, tk), lambda i, k: (i, k)),        # x tile
                pl.BlockSpec((C_pad, tk), lambda i, k: (0, k)),     # weight tile
                pl.BlockSpec((1, C_pad), lambda i, k: (0, 0)),      # bias (resident)
            ],
            out_specs=pl.BlockSpec((tm, C_pad), lambda i, k: (i, 0)),
            scratch_shapes=[pltpu.VMEM((tm, C_pad), jnp.float32)],
        ),
        compiler_params=pltpu.CompilerParams(
            dimension_semantics=("parallel", "arbitrary"),
        ),
    )(x, weight, b2)
    return out[:B, :C]


# ----------------------------- test ------------------------------------------


if __name__ == "__main__":
    # Small shapes implied by the module: x is [batch, in_features],
    # output is [batch, num_classes] with num_classes = 2.
    B, F, C = 8, 32, 2

    key = jax.random.PRNGKey(0)
    kx, kw, kb = jax.random.split(key, 3)

    x = jax.random.normal(kx, (B, F), dtype=jnp.float32)

    # Deterministic nn.Linear-style init (uniform in +/- 1/sqrt(F)).
    bound = 1.0 / jnp.sqrt(jnp.float32(F))
    weight = jax.random.uniform(kw, (C, F), minval=-bound, maxval=bound,
                                dtype=jnp.float32)
    bias = jax.random.uniform(kb, (C,), minval=-bound, maxval=bound,
                              dtype=jnp.float32)

    out = jax.block_until_ready(svm_forward(x, weight, bias))
    ref = x @ weight.T + bias
    assert out.shape == (B, C)
    assert jnp.allclose(out, ref, atol=1e-5, rtol=1e-5)

    # Also exercise the tiled (grid) accumulator path with small forced tiles.
    B2, F2 = 48, 384
    kx2, kw2, kb2 = jax.random.split(jax.random.PRNGKey(1), 3)
    x2 = jax.random.normal(kx2, (B2, F2), dtype=jnp.float32)
    bound2 = 1.0 / jnp.sqrt(jnp.float32(F2))
    w2 = jax.random.uniform(kw2, (C, F2), minval=-bound2, maxval=bound2,
                            dtype=jnp.float32)
    bi2 = jax.random.uniform(kb2, (C,), minval=-bound2, maxval=bound2,
                             dtype=jnp.float32)
    out2 = jax.block_until_ready(svm_forward(x2, w2, bi2, tm=16, tk=128))
    ref2 = x2 @ w2.T + bi2
    assert out2.shape == (B2, C)
    assert jnp.allclose(out2, ref2, atol=1e-4, rtol=1e-4)

    print("KERNEL_OK")
</pallas_src>

<mosaic_0001>
module attributes {stable_mosaic.version = 11 : i64} {
  func.func @_svm_single_block_kernel(%arg0: memref<8x32xf32, #tpu.memory_space<vmem>>, %arg1: memref<128x32xf32, #tpu.memory_space<vmem>>, %arg2: memref<1x128xf32, #tpu.memory_space<vmem>>, %arg3: memref<8x128xf32, #tpu.memory_space<vmem>>) attributes {dimension_semantics = [], scalar_prefetch = 0 : i64, scratch_operands = 0 : i64, tpu.core_type = #tpu.core_type<tc>} {
    %c0 = arith.constant 0 : index
    %c0_0 = arith.constant 0 : index
    %0 = vector.load %arg0[%c0, %c0_0] : memref<8x32xf32, #tpu.memory_space<vmem>>, vector<8x32xf32>
    %c0_1 = arith.constant 0 : index
    %c0_2 = arith.constant 0 : index
    %1 = vector.load %arg1[%c0_1, %c0_2] : memref<128x32xf32, #tpu.memory_space<vmem>>, vector<128x32xf32>
    %cst = arith.constant dense<0.000000e+00> : vector<8x128xf32>
    %2 = tpu.matmul %0, %1, %cst {dimension_numbers = #tpu.dot_dimension_numbers<[1], [1], [0], [0], [0, 0, 1, 0], [], []>} : vector<8x32xf32>, vector<128x32xf32>, vector<8x128xf32> -> vector<8x128xf32>
    %c0_3 = arith.constant 0 : index
    %c0_4 = arith.constant 0 : index
    %3 = vector.load %arg2[%c0_3, %c0_4] : memref<1x128xf32, #tpu.memory_space<vmem>>, vector<1x128xf32>
    %4 = vector.broadcast %3 : vector<1x128xf32> to vector<8x128xf32>
    %5 = arith.addf %2, %4 : vector<8x128xf32>
    %c0_5 = arith.constant 0 : index
    %c0_6 = arith.constant 0 : index
    %6 = vector.load %arg3[%c0_5, %c0_6] : memref<8x128xf32, #tpu.memory_space<vmem>>, vector<8x128xf32>
    tpu.vector_store %arg3[%c0_5, %c0_6], %5 {strides = array<i32>} : memref<8x128xf32, #tpu.memory_space<vmem>>, vector<8x128xf32>,
    return
  }
}

</mosaic_0001>

<bundles_post_ra>
// kernel: tpu_custom_call.1
= control target key start
LH: loop header
LB: loop body
LE: loop exit
PB: predicated region body
PF: predicated region fallthrough
CT: control target
= control target key end

     0   :  { %vm39_vm0 = vcmask 261120   ;;  %v271_v1 = vmov 0.0   ;;  %vm272_vm1 = vmmov 0   ;;  %s368_s0 = inlined_call_operand.vmem [shape: f32[8,32], index: 0, kind: input, shape index: {}]   ;;  %s369_s1 = inlined_call_operand.vmem [shape: f32[128,32], index: 1, kind: input, shape index: {}]   ;;  %s370_s2 = inlined_call_operand.vmem [shape: f32[1,128], index: 2, kind: input, shape index: {}]   ;;  %s371_s3 = inlined_call_operand.hbm [shape: f32[8,128], index: 3, kind: output, shape index: {}]  }
   0x1   :  { %v31_v0 = vld [vmem:[%s369_s1 + $0x78] sm:$0xff]  ;;  %211 = vmatprep.subr.mxu0 %v271_v1  ;;  %243 = vmatprep.mubr.msk.f32.mxu0 %vm272_vm1, %v271_v1  ;;  %v30_v2 = vld [vmem:[%s369_s1 + $0x70] sm:$0xff] }
   0x2   :  { %212 = vmatpush3.xpose.msk.msra.mxu0 %vm39_vm0, %v31_v0 }
   0x3   :  { %213 = vmatprep.subr.mxu0 %v271_v1 }
   0x6   :  { %214 = vmatpush3.xpose.msk.msra.mxu0 %vm39_vm0, %v30_v2 }
   0x7   :  { %8 = vsyncpa [#allocation3], 0  ;;  %215 = vmatprep.subr.mxu0 %v271_v1  ;;  %v29_v3 = vld [vmem:[%s369_s1 + $0x68] sm:$0xff]  ;;  %v28_v4 = vld [vmem:[%s369_s1 + $0x60] sm:$0xff]  ;;  %s273_s21 = smov [#allocation2]  }
   0x8   :  { %v27_v5 = vld [vmem:[%s369_s1 + $0x58] sm:$0xff]  ;;  %v26_v6 = vld [vmem:[%s369_s1 + $0x50] sm:$0xff]  ;;  %v25_v7 = vld [vmem:[%s369_s1 + $0x48] sm:$0xff]  ;;  %s168_s22 = sshll.u32 %s273_s21, 4  ;;  %s169_s22 = int_to_ptr.vmem [resolvable:$true] %s168_s22 }
   0x9   :  { %v24_v8 = vld [vmem:[%s369_s1 + $0x40] sm:$0xff]  ;;  %v23_v9 = vld [vmem:[%s369_s1 + $0x38] sm:$0xff]  ;;  %v22_v10 = vld [vmem:[%s369_s1 + $0x30] sm:$0xff]  ;;  %p254_p1 = scmp.lt.s32.totalorder %s169_s22, %s169_s22 }
   0xa   :  { %216 = vmatpush3.xpose.msk.msra.mxu0 %vm39_vm0, %v29_v3  ;;  %v21_v11 = vld [vmem:[%s369_s1 + $0x28] sm:$0xff]  ;;  %v20_v12 = vld [vmem:[%s369_s1 + $0x20] sm:$0xff]  ;;  %v19_v13 = vld [vmem:[%s369_s1 + $0x18] sm:$0xff] }
   0xb   :  { %217 = vmatprep.subr.mxu0 %v271_v1  ;;  %v18_v14 = vld [vmem:[%s369_s1 + $0x10] sm:$0xff]  ;;  %v17_v15 = vld [vmem:[%s369_s1 + $0x8] sm:$0xff]  ;;  %v16_v16 = vld [vmem:[%s369_s1] sm:$0xff]  ;;  %s249_s1 = scalar_lea.vmem %s169_s22, 128 }
   0xc   :  { %v15_v17 = vld [vmem:[%s368_s0] sm:$0xff]  ;;  %p250_p0 = scmp.ne.s32.totalorder %s169_s22, %s249_s1  ;;  %p255_p2 = scmp.lt.s32.totalorder %s249_s1, %s249_s1 }
   0xd   :  { %v176_v18 = vld [vmem:[%s370_s2] ss:$0 sm:$0xff] }
   0xe   :  { %218 = vmatpush3.xpose.msk.msra.mxu0 %vm39_vm0, %v28_v4  ;;  %p256_p3 = por %p255_p2, %p254_p1 }
   0xf   :  { %219 = vmatprep.subr.mxu0 %v271_v1 }
  0x10   :  { %p257_p4 = pnand %p256_p3, %p250_p0 }
  0x12   :  { %220 = vmatpush3.xpose.msk.msra.mxu0 %vm39_vm0, %v27_v5 }
  0x13   :  { %221 = vmatprep.subr.mxu0 %v271_v1 }
  0x16   :  { %222 = vmatpush3.xpose.msk.msra.mxu0 %vm39_vm0, %v26_v6 }
  0x17   :  { %223 = vmatprep.subr.mxu0 %v271_v1 }
  0x1a   :  { %224 = vmatpush3.xpose.msk.msra.mxu0 %vm39_vm0, %v25_v7 }
  0x1b   :  { %225 = vmatprep.subr.mxu0 %v271_v1 }
  0x1e   :  { %226 = vmatpush3.xpose.msk.msra.mxu0 %vm39_vm0, %v24_v8 }
  0x1f   :  { %227 = vmatprep.subr.mxu0 %v271_v1 }
  0x22   :  { %228 = vmatpush3.xpose.msk.msra.mxu0 %vm39_vm0, %v23_v9 }
  0x23   :  { %229 = vmatprep.subr.mxu0 %v271_v1 }
  0x26   :  { %230 = vmatpush3.xpose.msk.msra.mxu0 %vm39_vm0, %v22_v10 }
  0x27   :  { %231 = vmatprep.subr.mxu0 %v271_v1 }
  0x2a   :  { %232 = vmatpush3.xpose.msk.msra.mxu0 %vm39_vm0, %v21_v11 }
  0x2b   :  { %233 = vmatprep.subr.mxu0 %v271_v1 }
  0x2e   :  { %234 = vmatpush3.xpose.msk.msra.mxu0 %vm39_vm0, %v20_v12 }
  0x2f   :  { %235 = vmatprep.subr.mxu0 %v271_v1 }
  0x32   :  { %236 = vmatpush3.xpose.msk.msra.mxu0 %vm39_vm0, %v19_v13 }
  0x33   :  { %237 = vmatprep.subr.mxu0 %v271_v1 }
  0x36   :  { %238 = vmatpush3.xpose.msk.msra.mxu0 %vm39_vm0, %v18_v14 }
  0x37   :  { %239 = vmatprep.subr.mxu0 %v271_v1 }
  0x3a   :  { %240 = vmatpush3.xpose.msk.msra.mxu0 %vm39_vm0, %v17_v15 }
  0x3b   :  { %241 = vmatprep.subr.mxu0 %v271_v1 }
  0x3e   :  { %242 = vmatpush3.xpose.msk.msra.mxu0 %vm39_vm0, %v16_v16 }
  0x41   :  { %244 = vmatmul.mubr.msk.f32.vlgmr.msra.gmra.mxu0 %vm39_vm0, %v15_v17 }
 0x101   :  { %v157_v19 = vpop.f32.mrf.mxu0 }
 0x102   :  { %v158_v20 = vadd.f32 %v176_v18, %v157_v19 }
 0x103   :  { %v245_v21 = vpop.f32.mrf.mxu0 }
 0x104   :  { %161 = vst [vmem:[#allocation2] sm:$0xff] %v158_v20 }
 0x105   :  { %260 = shalt.err (!%p257_p4)
}
 0x106   :  { %171 = dma.vmem_to_hbm [thread:$0]  %s169_s22, 128, %s371_s3, [#allocation3]  }
 0x107   :  { %269 = dma.done.wait [#allocation3], 128  }
 0x108   :  { %270 = vsyncadd [#allocation3], 4294967168 }
 0x109   :  { %175 = vsyncpa [#allocation3], 1 }

</bundles_post_ra>
